<compile_context>
chip_gen: v5e
topology: v5e:2x2
jax: 0.10.0
libtpu: 0.0.40
codegen_flags: <defaults>
</compile_context>

<pallas_src>
import jax
import jax.numpy as jnp
from jax.experimental import pallas as pl
from jax.experimental.pallas import tpu as pltpu


# ----------------------------- Pallas kernel ---------------------------------

def _sage_fused_kernel(a_ref, invdeg_ref, x0_ref, wcat_ref, b_ref, o_ref):
    """All SAGEConv layers, fully unrolled in one invocation.

    a_ref      : (N, N)      bf16  raw adjacency counts A[i, j] = #edges j->i (exact)
    invdeg_ref : (N, 1)      f32   1 / max(in_degree, 1)
    x0_ref     : (N, F)      bf16  input node features (zero-padded to F lanes)
    wcat_ref   : (L, F, 2F)  bf16  per-layer [W_l^T | W_r^T] concatenated on lanes
    b_ref      : (L, 1, F)   f32   per-layer lin_l bias
    o_ref      : (N, F)      f32   last-layer output (no ReLU)
    """
    num_layers = wcat_ref.shape[0]
    f_pad = x0_ref.shape[1]

    a = a_ref[...]                         # (N, N) bf16, exact integer counts
    inv_deg = invdeg_ref[...]              # (N, 1) f32, exact normalization
    x = x0_ref[...]                        # (N, F) bf16 activations

    y = None
    for l in range(num_layers):            # static unroll — single grid step total
        w = wcat_ref[l]                    # (F, 2F) bf16 = [Wl^T | Wr^T]
        # One 256-lane matmul covers both the aggregation and the root transform.
        xw = jnp.dot(x, w, preferred_element_type=jnp.float32)     # (N, 2F) f32
        xw_l = xw[:, :f_pad]               # tile-aligned lane slices (no copy)
        xw_r = xw[:, f_pad:]
        # Exact reorder: (diag(1/deg) @ A @ x) @ Wl == inv_deg * (A @ (x @ Wl)).
        agg = jnp.dot(a, xw_l.astype(jnp.bfloat16),
                      preferred_element_type=jnp.float32)          # (N, F) f32
        y = agg * inv_deg + xw_r + b_ref[l]                        # f32 scale + bias
        if l < num_layers - 1:
            x = jnp.maximum(y, 0.0).astype(jnp.bfloat16)           # ReLU -> next layer

    o_ref[...] = y.astype(o_ref.dtype)


def sage_dist_pallas(a_pad, inv_deg, x_pad, wcat_all, b_all):
    """Single pallas_call, no grid — everything resident in VMEM (trivially fits)."""
    n_pad, f_pad = x_pad.shape
    return pl.pallas_call(
        _sage_fused_kernel,
        out_shape=jax.ShapeDtypeStruct((n_pad, f_pad), jnp.float32),
        in_specs=[pl.BlockSpec(memory_space=pltpu.MemorySpace.VMEM)] * 5,
        out_specs=pl.BlockSpec(memory_space=pltpu.MemorySpace.VMEM),
    )(a_pad, inv_deg, x_pad, wcat_all, b_all)


# ------------------------------ model glue -----------------------------------

def _round_up(x, m):
    return ((x + m - 1) // m) * m


def _pad2(w, rows, cols, dtype):
    out = jnp.zeros((rows, cols), dtype)
    return out.at[: w.shape[0], : w.shape[1]].set(w.astype(dtype))


def init_sage_params(key, in_channels, hidden_channels, out_channels, num_layers):
    """Each layer: (W_l^T (f_in, f_out), W_r^T (f_in, f_out), bias (1, f_out))."""
    dims = [in_channels] + [hidden_channels] * (num_layers - 1) + [out_channels]
    params = []
    for li in range(num_layers):
        f_in, f_out = dims[li], dims[li + 1]
        key, k1, k2 = jax.random.split(key, 3)
        bound = (6.0 / (f_in + f_out)) ** 0.5  # glorot-uniform like PyG Linear
        w_l = jax.random.uniform(k1, (f_in, f_out), jnp.float32, -bound, bound)
        w_r = jax.random.uniform(k2, (f_in, f_out), jnp.float32, -bound, bound)
        b = jnp.zeros((1, f_out), jnp.float32)
        params.append((w_l, w_r, b))
    return params


def build_adjacency(edge_index, num_nodes):
    """Raw adjacency counts A[i, j] = #edges j->i, plus exact f32 1/deg row scale."""
    src, dst = edge_index[0], edge_index[1]
    a = jnp.zeros((num_nodes, num_nodes), jnp.float32).at[dst, src].add(1.0)
    deg = jnp.sum(a, axis=1, keepdims=True)
    inv_deg = 1.0 / jnp.maximum(deg, 1.0)   # deg-0 nodes aggregate to 0 (PyG scatter-mean)
    return a, inv_deg


def sage_dist_forward(x, edge_index, params, dropout=0.5):
    # TODO(synk): F.dropout(p, training=self.training) — only eval-mode (identity) here.
    del dropout
    n, f_in = x.shape
    dims = [f_in] + [w_l.shape[1] for (w_l, _, _) in params]
    f_out = dims[-1]

    # Lane (last) dim padded to 128; node dim only to the bf16 sublane multiple (16)
    # since all blocks are full-array. Zero padding is exact through all layers.
    f_pad = _round_up(max(dims), 128)
    n_pad = _round_up(n, 16)

    a, inv_deg = build_adjacency(edge_index, n)
    a_pad = _pad2(a, n_pad, n_pad, jnp.bfloat16)          # small int counts: exact in bf16
    invdeg_pad = _pad2(inv_deg, n_pad, 1, jnp.float32)
    x_pad = _pad2(x, n_pad, f_pad, jnp.bfloat16)

    # Per layer: [Wl^T | Wr^T] -> (f_pad, 2*f_pad); stacked -> (L, f_pad, 2*f_pad).
    wcat_all = jnp.stack([
        jnp.concatenate([_pad2(w_l, f_pad, f_pad, jnp.bfloat16),
                         _pad2(w_r, f_pad, f_pad, jnp.bfloat16)], axis=1)
        for (w_l, w_r, _) in params
    ])
    b_all = jnp.stack([_pad2(b, 1, f_pad, jnp.float32) for (_, _, b) in params])

    out_pad = sage_dist_pallas(a_pad, invdeg_pad, x_pad, wcat_all, b_all)
    return out_pad[:n, :f_out]


# --------------------------------- main ---------------------------------------

if __name__ == "__main__":
    in_channels, hidden_channels, out_channels = 32, 32, 16
    num_layers = 3
    num_nodes, num_edges = 64, 256

    key = jax.random.PRNGKey(0)
    k_feat, k_src, k_dst, k_param = jax.random.split(key, 4)

    x = jax.random.normal(k_feat, (num_nodes, in_channels), jnp.float32)
    src = jax.random.randint(k_src, (num_edges,), 0, num_nodes, jnp.int32)
    dst = jax.random.randint(k_dst, (num_edges,), 0, num_nodes, jnp.int32)
    edge_index = jnp.stack([src, dst], axis=0)  # (2, E)

    params = init_sage_params(k_param, in_channels, hidden_channels, out_channels, num_layers)

    out = sage_dist_forward(x, edge_index, params)
    out = jax.block_until_ready(out)
    assert out.shape == (num_nodes, out_channels)
    print("KERNEL_OK")
</pallas_src>

<mosaic_0001>
module attributes {stable_mosaic.version = 11 : i64} {
  func.func @_sage_fused_kernel(%arg0: memref<64x64xbf16, #tpu.memory_space<vmem>>, %arg1: memref<64x1xf32, #tpu.memory_space<vmem>>, %arg2: memref<64x128xbf16, #tpu.memory_space<vmem>>, %arg3: memref<3x128x256xbf16, #tpu.memory_space<vmem>>, %arg4: memref<3x1x128xf32, #tpu.memory_space<vmem>>, %arg5: memref<64x128xf32, #tpu.memory_space<vmem>>) attributes {dimension_semantics = [], scalar_prefetch = 0 : i64, scratch_operands = 0 : i64, tpu.core_type = #tpu.core_type<tc>} {
    %c0 = arith.constant 0 : index
    %c0_0 = arith.constant 0 : index
    %0 = vector.load %arg0[%c0, %c0_0] : memref<64x64xbf16, #tpu.memory_space<vmem>>, vector<64x64xbf16>
    %c0_1 = arith.constant 0 : index
    %c0_2 = arith.constant 0 : index
    %1 = vector.load %arg1[%c0_1, %c0_2] : memref<64x1xf32, #tpu.memory_space<vmem>>, vector<64x1xf32>
    %c0_3 = arith.constant 0 : index
    %c0_4 = arith.constant 0 : index
    %2 = vector.load %arg2[%c0_3, %c0_4] : memref<64x128xbf16, #tpu.memory_space<vmem>>, vector<64x128xbf16>
    %c0_5 = arith.constant 0 : index
    %c0_6 = arith.constant 0 : index
    %c0_7 = arith.constant 0 : index
    %3 = vector.load %arg3[%c0_5, %c0_6, %c0_7] : memref<3x128x256xbf16, #tpu.memory_space<vmem>>, vector<1x128x256xbf16>
    %4 = vector.shape_cast %3 : vector<1x128x256xbf16> to vector<128x256xbf16>
    %cst = arith.constant dense<0.000000e+00> : vector<64x256xf32>
    %5 = tpu.matmul %2, %4, %cst {dimension_numbers = #tpu.dot_dimension_numbers<[1], [0], [0], [1], [0, 0, 1, 1], [], []>} : vector<64x128xbf16>, vector<128x256xbf16>, vector<64x256xf32> -> vector<64x256xf32>
    %6 = vector.extract_strided_slice %5 {offsets = [0, 0], sizes = [64, 128], strides = [1, 1]} : vector<64x256xf32> to vector<64x128xf32>
    %7 = vector.extract_strided_slice %5 {offsets = [0, 128], sizes = [64, 128], strides = [1, 1]} : vector<64x256xf32> to vector<64x128xf32>
    %8 = arith.truncf %6 : vector<64x128xf32> to vector<64x128xbf16>
    %cst_8 = arith.constant dense<0.000000e+00> : vector<64x128xf32>
    %9 = tpu.matmul %0, %8, %cst_8 {dimension_numbers = #tpu.dot_dimension_numbers<[1], [0], [0], [1], [0, 0, 1, 1], [], []>} : vector<64x64xbf16>, vector<64x128xbf16>, vector<64x128xf32> -> vector<64x128xf32>
    %10 = vector.broadcast %1 : vector<64x1xf32> to vector<64x128xf32>
    %11 = arith.mulf %9, %10 : vector<64x128xf32>
    %12 = arith.addf %11, %7 : vector<64x128xf32>
    %c0_9 = arith.constant 0 : index
    %c0_10 = arith.constant 0 : index
    %c0_11 = arith.constant 0 : index
    %13 = vector.load %arg4[%c0_9, %c0_10, %c0_11] : memref<3x1x128xf32, #tpu.memory_space<vmem>>, vector<1x1x128xf32>
    %14 = vector.shape_cast %13 : vector<1x1x128xf32> to vector<1x128xf32>
    %15 = vector.broadcast %14 : vector<1x128xf32> to vector<64x128xf32>
    %16 = arith.addf %12, %15 : vector<64x128xf32>
    %cst_12 = arith.constant 0.000000e+00 : f32
    %17 = vector.broadcast %cst_12 : f32 to vector<64x128xf32>
    %18 = arith.maximumf %16, %17 : vector<64x128xf32>
    %19 = arith.truncf %18 : vector<64x128xf32> to vector<64x128xbf16>
    %c1 = arith.constant 1 : index
    %c0_13 = arith.constant 0 : index
    %c0_14 = arith.constant 0 : index
    %20 = vector.load %arg3[%c1, %c0_13, %c0_14] : memref<3x128x256xbf16, #tpu.memory_space<vmem>>, vector<1x128x256xbf16>
    %21 = vector.shape_cast %20 : vector<1x128x256xbf16> to vector<128x256xbf16>
    %cst_15 = arith.constant dense<0.000000e+00> : vector<64x256xf32>
    %22 = tpu.matmul %19, %21, %cst_15 {dimension_numbers = #tpu.dot_dimension_numbers<[1], [0], [0], [1], [0, 0, 1, 1], [], []>} : vector<64x128xbf16>, vector<128x256xbf16>, vector<64x256xf32> -> vector<64x256xf32>
    %23 = vector.extract_strided_slice %22 {offsets = [0, 0], sizes = [64, 128], strides = [1, 1]} : vector<64x256xf32> to vector<64x128xf32>
    %24 = vector.extract_strided_slice %22 {offsets = [0, 128], sizes = [64, 128], strides = [1, 1]} : vector<64x256xf32> to vector<64x128xf32>
    %25 = arith.truncf %23 : vector<64x128xf32> to vector<64x128xbf16>
    %cst_16 = arith.constant dense<0.000000e+00> : vector<64x128xf32>
    %26 = tpu.matmul %0, %25, %cst_16 {dimension_numbers = #tpu.dot_dimension_numbers<[1], [0], [0], [1], [0, 0, 1, 1], [], []>} : vector<64x64xbf16>, vector<64x128xbf16>, vector<64x128xf32> -> vector<64x128xf32>
    %27 = vector.broadcast %1 : vector<64x1xf32> to vector<64x128xf32>
    %28 = arith.mulf %26, %27 : vector<64x128xf32>
    %29 = arith.addf %28, %24 : vector<64x128xf32>
    %c1_17 = arith.constant 1 : index
    %c0_18 = arith.constant 0 : index
    %c0_19 = arith.constant 0 : index
    %30 = vector.load %arg4[%c1_17, %c0_18, %c0_19] : memref<3x1x128xf32, #tpu.memory_space<vmem>>, vector<1x1x128xf32>
    %31 = vector.shape_cast %30 : vector<1x1x128xf32> to vector<1x128xf32>
    %32 = vector.broadcast %31 : vector<1x128xf32> to vector<64x128xf32>
    %33 = arith.addf %29, %32 : vector<64x128xf32>
    %cst_20 = arith.constant 0.000000e+00 : f32
    %34 = vector.broadcast %cst_20 : f32 to vector<64x128xf32>
    %35 = arith.maximumf %33, %34 : vector<64x128xf32>
    %36 = arith.truncf %35 : vector<64x128xf32> to vector<64x128xbf16>
    %c2 = arith.constant 2 : index
    %c0_21 = arith.constant 0 : index
    %c0_22 = arith.constant 0 : index
    %37 = vector.load %arg3[%c2, %c0_21, %c0_22] : memref<3x128x256xbf16, #tpu.memory_space<vmem>>, vector<1x128x256xbf16>
    %38 = vector.shape_cast %37 : vector<1x128x256xbf16> to vector<128x256xbf16>
    %cst_23 = arith.constant dense<0.000000e+00> : vector<64x256xf32>
    %39 = tpu.matmul %36, %38, %cst_23 {dimension_numbers = #tpu.dot_dimension_numbers<[1], [0], [0], [1], [0, 0, 1, 1], [], []>} : vector<64x128xbf16>, vector<128x256xbf16>, vector<64x256xf32> -> vector<64x256xf32>
    %40 = vector.extract_strided_slice %39 {offsets = [0, 0], sizes = [64, 128], strides = [1, 1]} : vector<64x256xf32> to vector<64x128xf32>
    %41 = vector.extract_strided_slice %39 {offsets = [0, 128], sizes = [64, 128], strides = [1, 1]} : vector<64x256xf32> to vector<64x128xf32>
    %42 = arith.truncf %40 : vector<64x128xf32> to vector<64x128xbf16>
    %cst_24 = arith.constant dense<0.000000e+00> : vector<64x128xf32>
    %43 = tpu.matmul %0, %42, %cst_24 {dimension_numbers = #tpu.dot_dimension_numbers<[1], [0], [0], [1], [0, 0, 1, 1], [], []>} : vector<64x64xbf16>, vector<64x128xbf16>, vector<64x128xf32> -> vector<64x128xf32>
    %44 = vector.broadcast %1 : vector<64x1xf32> to vector<64x128xf32>
    %45 = arith.mulf %43, %44 : vector<64x128xf32>
    %46 = arith.addf %45, %41 : vector<64x128xf32>
    %c2_25 = arith.constant 2 : index
    %c0_26 = arith.constant 0 : index
    %c0_27 = arith.constant 0 : index
    %47 = vector.load %arg4[%c2_25, %c0_26, %c0_27] : memref<3x1x128xf32, #tpu.memory_space<vmem>>, vector<1x1x128xf32>
    %48 = vector.shape_cast %47 : vector<1x1x128xf32> to vector<1x128xf32>
    %49 = vector.broadcast %48 : vector<1x128xf32> to vector<64x128xf32>
    %50 = arith.addf %46, %49 : vector<64x128xf32>
    %c0_28 = arith.constant 0 : index
    %c0_29 = arith.constant 0 : index
    %51 = vector.load %arg5[%c0_28, %c0_29] : memref<64x128xf32, #tpu.memory_space<vmem>>, vector<64x128xf32>
    tpu.vector_store %arg5[%c0_28, %c0_29], %50 {strides = array<i32>} : memref<64x128xf32, #tpu.memory_space<vmem>>, vector<64x128xf32>,
    return
  }
}

</mosaic_0001>

<bundles_post_ra>
// kernel: tpu_custom_call.1
= control target key start
LH: loop header
LB: loop body
LE: loop exit
PB: predicated region body
PF: predicated region fallthrough
CT: control target
= control target key end

     0   :  { %10 = vsyncpa [#allocation3], 0  ;;  %s1400_s0 = inlined_call_operand.vmem [shape: bf16[64,64], index: 0, kind: input, shape index: {}]   ;;  %s1401_s1 = inlined_call_operand.vmem [shape: f32[64,1], index: 1, kind: input, shape index: {}]   ;;  %s1402_s2 = inlined_call_operand.vmem [shape: bf16[64,128], index: 2, kind: input, shape index: {}]   ;;  %s1403_s3 = inlined_call_operand.hbm [shape: bf16[3,128,256], index: 3, kind: input, shape index: {}]   ;;  %s1404_s4 = inlined_call_operand.vmem [shape: f32[3,1,128], index: 4, kind: input, shape index: {}]   ;;  %s1405_s5 = inlined_call_operand.hbm [shape: f32[64,128], index: 5, kind: output, shape index: {}]  }
   0x1   :  { %11 = vsyncpa [#allocation4], 0  ;;  %s22_s20 = sshll.u32 %s1403_s3, 4  ;;  %s1220_s21 = smov [#allocation2]   ;;  %s23_s20 = int_to_ptr.hbm [resolvable:$true] %s22_s20 }
   0x2   :  { %s24_s22 = sshll.u32 %s1220_s21, 4  ;;  %s1221_s23 = smov 128   ;;  %s25_s22 = int_to_ptr.vmem [resolvable:$true] %s24_s22 }
   0x3   :  { %s1222_s24 = smov 8  }
   0x4   :  { %30 = dma.hbm_to_vmem [thread:$0]  %s23_s20, 6144, %s25_s22, [#allocation3], %s1221_s23, %s1221_s23, %s1222_s24  }
   0x5   :  { %1216 = dma.done.wait [#allocation3], 6144  }
   0x6   :  { %1217 = vsyncadd [#allocation3], 4294961152  ;;  %v933_v0 = vld [vmem:[#allocation2 + $0x70] sm:$0xf]  ;;  %v1120_v1 = vld [vmem:[#allocation2 + $0x74] sm:$0xf0] }
   0x7   :  { %v925_v2 = vld [vmem:[#allocation2 + $0x60] sm:$0xf]  ;;  %v934_v3 = vor.u32 %v1120_v1, %v933_v0  ;;  %v1118_v4 = vld [vmem:[#allocation2 + $0x64] sm:$0xf0]  ;;  %v917_v6 = vld [vmem:[#allocation2 + $0x50] sm:$0xf] }
   0x8   :  { %v926_v5 = vor.u32 %v1118_v4, %v925_v2  ;;  %v1116_v7 = vld [vmem:[#allocation2 + $0x54] sm:$0xf0]  ;;  %v909_v9 = vld [vmem:[#allocation2 + $0x40] sm:$0xf]  ;;  %v1114_v10 = vld [vmem:[#allocation2 + $0x44] sm:$0xf0] }
   0x9   :  { %182 = vmatpush.bf16.msra.mxu0 %v934_v3  ;;  %v918_v8 = vor.u32 %v1116_v7, %v917_v6  ;;  %v910_v11 = vor.u32 %v1114_v10, %v909_v9  ;;  %v901_v12 = vld [vmem:[#allocation2 + $0x30] sm:$0xf]  ;;  %v1112_v13 = vld [vmem:[#allocation2 + $0x34] sm:$0xf0]  ;;  %v893_v15 = vld [vmem:[#allocation2 + $0x20] sm:$0xf] }
   0xa   :  { %v902_v14 = vor.u32 %v1112_v13, %v901_v12  ;;  %v1110_v16 = vld [vmem:[#allocation2 + $0x24] sm:$0xf0]  ;;  %v885_v18 = vld [vmem:[#allocation2 + $0x10] sm:$0xf]  ;;  %v1108_v19 = vld [vmem:[#allocation2 + $0x14] sm:$0xf0] }
   0xb   :  { %v894_v17 = vor.u32 %v1110_v16, %v893_v15  ;;  %v886_v20 = vor.u32 %v1108_v19, %v885_v18  ;;  %v877_v21 = vld [vmem:[#allocation2] sm:$0xf]  ;;  %v1106_v22 = vld [vmem:[#allocation2 + $0x4] sm:$0xf0]  ;;  %v1103_v26 = vld [vmem:[%s1402_s2 + $0x10] sm:$0xff]  ;;  %v1223_v58 = vmov 0  }
   0xc   :  { %v878_v23 = vor.u32 %v1106_v22, %v877_v21  ;;  %v1101_v24 = vld [vmem:[%s1402_s2] sm:$0xff]  ;;  %v1102_v25 = vld [vmem:[%s1402_s2 + $0x8] sm:$0xff]  ;;  %v1273_v27 = vld [vmem:[%s1402_s2 + $0x18] sm:$0xff]  ;;  %1162 = vset.pattern.permute.xlu0 %v1223_v58  ;;  %1163 = vset.pattern.permute.xlu1 %v1223_v58  ;;  %vm264_vm0 = vcmask 523264   ;;  %s846_s12 = sshll.u32 %s1405_s5, 4  ;;  %s847_s12 = int_to_ptr.hbm [resolvable:$true] %s846_s12 }
   0xd   :  { %183 = vmatpush.bf16.msra.mxu0 %v926_v5  ;;  %v1119_v28 = vld [vmem:[#allocation2 + $0x74] sm:$0xf]  ;;  %v935_v29 = vld [vmem:[#allocation2 + $0x78] sm:$0xf0]  ;;  %v1117_v30 = vld [vmem:[#allocation2 + $0x64] sm:$0xf]  ;;  %1164 = vset.pattern.permute.xlu2 %v1223_v58 }
   0xe   :  { %v938_v31 = vor.u32 %v1119_v28, %v935_v29  ;;  %v927_v32 = vld [vmem:[#allocation2 + $0x68] sm:$0xf0]  ;;  %v1115_v34 = vld [vmem:[#allocation2 + $0x54] sm:$0xf]  ;;  %v919_v35 = vld [vmem:[#allocation2 + $0x58] sm:$0xf0] }
   0xf   :  { %v930_v33 = vor.u32 %v1117_v30, %v927_v32  ;;  %v922_v36 = vor.u32 %v1115_v34, %v919_v35  ;;  %v1113_v37 = vld [vmem:[#allocation2 + $0x44] sm:$0xf]  ;;  %v911_v38 = vld [vmem:[#allocation2 + $0x48] sm:$0xf0]  ;;  %v1111_v41 = vld [vmem:[#allocation2 + $0x34] sm:$0xf] }
  0x10   :  { %211 = vmatpush.bf16.msra.mxu1 %v938_v31  ;;  %v914_v39 = vor.u32 %v1113_v37, %v911_v38  ;;  %v903_v42 = vld [vmem:[#allocation2 + $0x38] sm:$0xf0]  ;;  %v1109_v43 = vld [vmem:[#allocation2 + $0x24] sm:$0xf]  ;;  %v895_v45 = vld [vmem:[#allocation2 + $0x28] sm:$0xf0] }
  0x11   :  { %184 = vmatpush.bf16.msra.mxu0 %v918_v8  ;;  %v906_v44 = vor.u32 %v1111_v41, %v903_v42  ;;  %v898_v46 = vor.u32 %v1109_v43, %v895_v45  ;;  %v1107_v48 = vld [vmem:[#allocation2 + $0x14] sm:$0xf]  ;;  %v887_v49 = vld [vmem:[#allocation2 + $0x18] sm:$0xf0]  ;;  %v1105_v51 = vld [vmem:[#allocation2 + $0x4] sm:$0xf] }
  0x12   :  { %v890_v50 = vor.u32 %v1107_v48, %v887_v49  ;;  %v879_v52 = vld [vmem:[#allocation2 + $0x8] sm:$0xf0]  ;;  %v46_v57 = vld [vmem:[%s1401_s1] sm:$0xff]  ;;  %v48_v61 = vld [vmem:[%s1401_s1 + $0x10] sm:$0xff] }
  0x13   :  { %v882_v53 = vor.u32 %v1105_v51, %v879_v52  ;;  %308 = vperm.xlu0 %1162, %v46_v57   ;;  %v47_v60 = vld [vmem:[%s1401_s1 + $0x8] sm:$0xff]  ;;  %318 = vperm.xlu1 %1163, %v48_v61   ;;  %v52_v63 = vld [vmem:[%s1401_s1 + $0x30] sm:$0xff]  ;;  %v49_v2 = vld [vmem:[%s1401_s1 + $0x18] sm:$0xff] }
  0x14   :  { %212 = vmatpush.bf16.msra.mxu1 %v930_v33  ;;  %v50_v3 = vld [vmem:[%s1401_s1 + $0x20] sm:$0xff]  ;;  %v53_v6 = vld [vmem:[%s1401_s1 + $0x38] sm:$0xff]  ;;  %v51_v7 = vld [vmem:[%s1401_s1 + $0x28] sm:$0xff] }
  0x15   :  { %185 = vmatpush.bf16.msra.mxu0 %v910_v11  ;;  %328 = vperm.xlu2 %1164, %v50_v3   ;;  %v1304_v9 = vld [vmem:[%s1400_s0] sm:$0xff]  ;;  %v1309_v10 = vld [vmem:[%s1400_s0 + $0x10] sm:$0xff]  ;;  %v1318_v11 = vld [vmem:[%s1400_s0 + $0x8] sm:$0xff] }
  0x16   :  { %v1323_v12 = vld [vmem:[%s1400_s0 + $0x18] sm:$0xff]  ;;  %v1017_v13 = vld [vmem:[#allocation2 + $0xf0] sm:$0xf]  ;;  %v1135_v15 = vld [vmem:[#allocation2 + $0xf4] sm:$0xf] }
  0x17   :  { %v1009_v19 = vld [vmem:[#allocation2 + $0xe0] sm:$0xf]  ;;  %v1133_v21 = vld [vmem:[#allocation2 + $0xe4] sm:$0xf]  ;;  %v1003_v28 = vld [vmem:[#allocation2 + $0xd8] sm:$0xf0] }
  0x18   :  { %213 = vmatpush.bf16.msra.mxu1 %v922_v36  ;;  %v993_v31 = vld [vmem:[#allocation2 + $0xc0] sm:$0xf]  ;;  %v1130_v32 = vld [vmem:[#allocation2 + $0xc4] sm:$0xf0]  ;;  %v1129_v33 = vld [vmem:[#allocation2 + $0xc4] sm:$0xf] }
  0x19   :  { %186 = vmatpush.bf16.msra.mxu0 %v902_v14  ;;  %v1136_v14 = vld [vmem:[#allocation2 + $0xf4] sm:$0xf0]  ;;  %v994_v34 = vor.u32 %v1130_v32, %v993_v31  ;;  %v995_v35 = vld [vmem:[#allocation2 + $0xc8] sm:$0xf0]  ;;  %v985_v37 = vld [vmem:[#allocation2 + $0xb0] sm:$0xf] }
  0x1a   :  { %v1018_v16 = vor.u32 %v1136_v14, %v1017_v13  ;;  %v998_v36 = vor.u32 %v1129_v33, %v995_v35  ;;  %v1128_v38 = vld [vmem:[#allocation2 + $0xb4] sm:$0xf0]  ;;  %v987_v41 = vld [vmem:[#allocation2 + $0xb8] sm:$0xf0]  ;;  %v977_v43 = vld [vmem:[#allocation2 + $0xa0] sm:$0xf] }
  0x1b   :  { %313 = vperm.xlu0 %1162, %v47_v60   ;;  %323 = vperm.xlu1 %1163, %v49_v2   ;;  %v1125_v45 = vld [vmem:[#allocation2 + $0xa4] sm:$0xf]  ;;  %v969_v49 = vld [vmem:[#allocation2 + $0x90] sm:$0xf]  ;;  %v1123_v51 = vld [vmem:[#allocation2 + $0x94] sm:$0xf] }
  0x1c   :  { %214 = vmatpush.bf16.msra.mxu1 %v914_v39  ;;  %483 = vmatpush.bf16.msra.mxu3 %v1018_v16  ;;  %v1127_v39 = vld [vmem:[#allocation2 + $0xb4] sm:$0xf]  ;;  %v1122_v57 = vld [vmem:[#allocation2 + $0x84] sm:$0xf0]  ;;  %v1121_v58 = vld [vmem:[#allocation2 + $0x84] sm:$0xf] }
  0x1d   :  { %187 = vmatpush.bf16.msra.mxu0 %v894_v17  ;;  %333 = vperm.xlu2 %1164, %v51_v7   ;;  %v1019_v17 = vld [vmem:[#allocation2 + $0xf8] sm:$0xf0]  ;;  %v990_v42 = vor.u32 %v1127_v39, %v987_v41  ;;  %v963_v60 = vld [vmem:[#allocation2 + $0x88] sm:$0xf0] }
  0x1e   :  { %v1022_v18 = vor.u32 %v1135_v15, %v1019_v17  ;;  %v966_v61 = vor.u32 %v1121_v58, %v963_v60 }
  0x20   :  { %215 = vmatpush.bf16.msra.mxu1 %v906_v44  ;;  %v1126_v44 = vld [vmem:[#allocation2 + $0xa4] sm:$0xf0] }
  0x21   :  { %188 = vmatpush.bf16.msra.mxu0 %v886_v20  ;;  %v1134_v20 = vld [vmem:[#allocation2 + $0xe4] sm:$0xf0] }
  0x22   :  { %v1010_v22 = vor.u32 %v1134_v20, %v1009_v19 }
  0x23   :  { %338 = vperm.xlu0 %1162, %v52_v63   ;;  %343 = vperm.xlu1 %1163, %v53_v6  }
  0x24   :  { %216 = vmatpush.bf16.msra.mxu1 %v898_v46  ;;  %484 = vmatpush.bf16.msra.mxu3 %v1010_v22  ;;  %v978_v46 = vor.u32 %v1126_v44, %v977_v43 }
  0x25   :  { %189 = vmatpush.bf16.msra.mxu0 %v878_v23  ;;  %v1011_v23 = vld [vmem:[#allocation2 + $0xe8] sm:$0xf0] }
  0x28   :  { %190 = vmatmul.bf16.vlgmr.msra.gmra.mxu0 %v1101_v24  ;;  %217 = vmatpush.bf16.msra.mxu1 %v890_v50  ;;  %v1124_v50 = vld [vmem:[#allocation2 + $0x94] sm:$0xf0] }
  0x29   :  { %v970_v52 = vor.u32 %v1124_v50, %v969_v49 }
  0x2c   :  { %218 = vmatpush.bf16.msra.mxu1 %v882_v53  ;;  %v971_v53 = vld [vmem:[#allocation2 + $0x98] sm:$0xf0] }
  0x2f   :  { %219 = vmatmul.bf16.vlgmr.msra.gmra.mxu1 %v1101_v24  ;;  %v1001_v24 = vld [vmem:[#allocation2 + $0xd0] sm:$0xf] }
  0x38   :  { %195 = vmatmul.bf16.gmra.mxu0 %v1102_v25 }
  0x3f   :  { %224 = vmatmul.bf16.gmra.mxu1 %v1102_v25  ;;  %v1132_v25 = vld [vmem:[#allocation2 + $0xd4] sm:$0xf0] }
  0x40   :  { %v1002_v29 = vor.u32 %v1132_v25, %v1001_v24 }
  0x42   :  { %485 = vmatpush.bf16.msra.mxu3 %v1002_v29 }
  0x46   :  { %486 = vmatpush.bf16.msra.mxu3 %v994_v34 }
  0x48   :  { %200 = vmatmul.bf16.gmra.mxu0 %v1103_v26 }
  0x4f   :  { %229 = vmatmul.bf16.gmra.mxu1 %v1103_v26  ;;  %v1014_v26 = vor.u32 %v1133_v21, %v1011_v23 }
  0x58   :  { %205 = vmatmul.bf16.gmra.mxu0 %v1273_v27 }
  0x5f   :  { %234 = vmatmul.bf16.gmra.mxu1 %v1273_v27  ;;  %v1131_v27 = vld [vmem:[#allocation2 + $0xd4] sm:$0xf] }
  0x60   :  { %v1006_v30 = vor.u32 %v1131_v27, %v1003_v28 }
  0x6f   :  { %v1341_v24 = vpop.permute.xlu2 %328 }
  0x77   :  { %v1346_v34 = vpop.permute.xlu2 %333 }
  0x85   :  { %v1329_v63 = vpop.permute.xlu0 %308  ;;  %v1338_v16 = vpop.permute.xlu1 %318 }
  0xa5   :  { %v191_v40 = vpop.f32.mrf.mxu0 }
  0xad   :  { %v193_v47 = vpop.f32.mrf.mxu0 }
  0xae   :  { %v240_v8 = vpack.c.bf16 %v193_v47, %v191_v40  ;;  %v986_v40 = vor.u32 %v1128_v38, %v985_v37  ;;  %v979_v47 = vld [vmem:[#allocation2 + $0xa8] sm:$0xf0] }
  0xaf   :  { %v982_v48 = vor.u32 %v1125_v45, %v979_v47 }
  0xb0   :  { %487 = vmatpush.bf16.msra.mxu3 %v986_v40 }
  0xb4   :  { %488 = vmatpush.bf16.msra.mxu3 %v978_v46 }
  0xb5   :  { %v196_v54 = vpop.f32.mrf.mxu0 }
  0xb8   :  { %489 = vmatpush.bf16.msra.mxu3 %v970_v52 }
  0xbd   :  { %v198_v55 = vpop.f32.mrf.mxu0 }
  0xbe   :  { %v241_v5 = vpack.c.bf16 %v198_v55, %v196_v54  ;;  %v974_v54 = vor.u32 %v1123_v51, %v971_v53  ;;  %v220_v55 = vpop.f32.mrf.mxu1 }
  0xc5   :  { %v201_v56 = vpop.f32.mrf.mxu0 }
  0xcd   :  { %v203_v59 = vpop.f32.mrf.mxu0 }
  0xce   :  { %v242_v4 = vpack.c.bf16 %v203_v59, %v201_v56  ;;  %v961_v56 = vld [vmem:[#allocation2 + $0x80] sm:$0xf] }
  0xcf   :  { %v962_v59 = vor.u32 %v1122_v57, %v961_v56 }
  0xd1   :  { %490 = vmatpush.bf16.msra.mxu3 %v962_v59 }
  0xd5   :  { %v206_v62 = vpop.f32.mrf.mxu0 }
  0xdd   :  { %v208_v0 = vpop.f32.mrf.mxu0 }
  0xde   :  { %v243_v1 = vpack.c.bf16 %v208_v0, %v206_v62  ;;  %v222_v62 = vpop.f32.mrf.mxu1 }
  0xe0   :  { %281 = vmatpush.bf16.msrb.mxu0 %v243_v1  ;;  %1153 = vmatpush.bf16.msra.mxu2 %v243_v1 }
  0xe4   :  { %282 = vmatpush.bf16.msrb.mxu0 %v242_v4  ;;  %1154 = vmatpush.bf16.msra.mxu2 %v242_v4  ;;  %v1165_v4 = vld [vmem:[%s1404_s4] ss:$0 sm:$0xff] }
  0xe6   :  { %v225_v0 = vpop.f32.mrf.mxu1 }
  0xe8   :  { %283 = vmatpush.bf16.msrb.mxu0 %v241_v5  ;;  %1155 = vmatpush.bf16.msra.mxu2 %v241_v5  ;;  %v1335_v5 = vpop.permute.xlu0 %313 }
  0xec   :  { %284 = vmatpush.bf16.msrb.mxu0 %v240_v8  ;;  %1156 = vmatpush.bf16.msra.mxu2 %v240_v8 }
  0xee   :  { %v227_v8 = vpop.f32.mrf.mxu1 }
  0xef   :  { %955 = vmatmul.msk.bf16.vlgmr.msrb.gmra.mxu0 %vm264_vm0, %v1304_v9  ;;  %957 = vmatmul.msk.bf16.vlgmr.msra.gmra.mxu2 %vm264_vm0, %v1309_v10 }
  0xf0   :  { %512 = vmatpush.bf16.msrb.mxu2 %v1022_v18  ;;  %v1353_v52 = vpop.permute.xlu0 %338 }
  0xf4   :  { %513 = vmatpush.bf16.msrb.mxu2 %v1014_v26  ;;  %v1343_v26 = vpop.permute.xlu1 %323 }
  0xf6   :  { %v230_v23 = vpop.f32.mrf.mxu1 }
  0xf8   :  { %514 = vmatpush.bf16.msrb.mxu2 %v1006_v30 }
  0xfc   :  { %515 = vmatpush.bf16.msrb.mxu2 %v998_v36  ;;  %v1350_v49 = vpop.permute.xlu1 %343 }
  0xfe   :  { %v232_v33 = vpop.f32.mrf.mxu1 }
  0xff   :  { %956 = vmatmul.msk.bf16.gmra.mxu0 %vm264_vm0, %v1318_v11  ;;  %958 = vmatmul.msk.bf16.gmra.mxu2 %vm264_vm0, %v1323_v12 }
 0x100   :  { %516 = vmatpush.bf16.msrb.mxu2 %v990_v42 }
 0x104   :  { %517 = vmatpush.bf16.msrb.mxu2 %v982_v48 }
 0x106   :  { %v235_v43 = vpop.f32.mrf.mxu1 }
 0x108   :  { %518 = vmatpush.bf16.msrb.mxu2 %v974_v54 }
 0x10c   :  { %519 = vmatpush.bf16.msrb.mxu2 %v966_v61 }
 0x10e   :  { %v237_v53 = vpop.f32.mrf.mxu1 }
 0x16c   :  { %v286_v1 = vpop.f32.mrf.mxu0 }
 0x16d   :  { %v346_v2 = vmul.f32 %v1329_v63, %v286_v1 }
 0x16f   :  { %v354_v3 = vadd.f32 %v346_v2, %v220_v55 }
 0x171   :  { %v366_v14 = vadd.f32 %v1165_v4, %v354_v3 }
 0x172   :  { %v296_v19 = vpop.f32.mrf.mxu2 }
 0x173   :  { %v374_v17 = vmax.f32 %v366_v14, 0.0  ;;  %v350_v37 = vmul.f32 %v1341_v24, %v296_v19  ;;  %v1151_v19 = vld [vmem:[#allocation2 + $0x174] sm:$0xf] }
 0x174   :  { %v288_v6 = vpop.f32.mrf.mxu0 }
 0x175   :  { %v347_v7 = vmul.f32 %v1335_v5, %v288_v6  ;;  %v358_v41 = vadd.f32 %v350_v37, %v230_v23  ;;  %v1150_v23 = vld [vmem:[#allocation2 + $0x164] sm:$0xf0] }
 0x177   :  { %v355_v13 = vadd.f32 %v347_v7, %v222_v62  ;;  %v370_v44 = vadd.f32 %v1165_v4, %v358_v41 }
 0x179   :  { %v367_v15 = vadd.f32 %v1165_v4, %v355_v13  ;;  %v378_v46 = vmax.f32 %v370_v44, 0.0  ;;  %v1054_v44 = vld [vmem:[#allocation2 + $0x130] sm:$0xf] }
 0x17a   :  { %v298_v29 = vpop.f32.mrf.mxu2 }
 0x17b   :  { %v375_v18 = vmax.f32 %v367_v15, 0.0  ;;  %v351_v38 = vmul.f32 %v1346_v34, %v298_v29 }
 0x17c   :  { %v291_v20 = vpop.f32.mrf.mxu0 }
 0x17d   :  { %v382_v21 = vpack.c.bf16 %v375_v18, %v374_v17  ;;  %v348_v22 = vmul.f32 %v1338_v16, %v291_v20  ;;  %v359_v42 = vadd.f32 %v351_v38, %v232_v33  ;;  %v1086_v17 = vld [vmem:[#allocation2 + $0x170] sm:$0xf]  ;;  %v1152_v18 = vld [vmem:[#allocation2 + $0x174] sm:$0xf0]  ;;  %v1147_v33 = vld [vmem:[#allocation2 + $0x154] sm:$0xf] }
 0x17e   :  { %v1087_v20 = vor.u32 %v1152_v18, %v1086_v17  ;;  %v1062_v38 = vld [vmem:[#allocation2 + $0x140] sm:$0xf] }
 0x17f   :  { %491 = vmatmul.bf16.vlgmr.msra.gmra.mxu3 %v382_v21  ;;  %520 = vmatmul.bf16.vlgmr.msrb.gmra.mxu2 %v382_v21  ;;  %v356_v25 = vadd.f32 %v348_v22, %v225_v0  ;;  %v371_v45 = vadd.f32 %v1165_v4, %v359_v42  ;;  %v1088_v21 = vld [vmem:[#allocation2 + $0x178] sm:$0xf0]  ;;  %v1078_v22 = vld [vmem:[#allocation2 + $0x160] sm:$0xf]  ;;  %v1064_v42 = vld [vmem:[#allocation2 + $0x148] sm:$0xf0] }
 0x180   :  { %712 = vmatpush.bf16.msrb.mxu1 %v1087_v20  ;;  %v1079_v29 = vor.u32 %v1150_v23, %v1078_v22  ;;  %v1166_v18 = vld [vmem:[%s1404_s4 + $0x1] ss:$0 sm:$0xff] }
 0x181   :  { %v368_v31 = vadd.f32 %v1165_v4, %v356_v25  ;;  %v379_v47 = vmax.f32 %v371_v45, 0.0  ;;  %v1091_v25 = vor.u32 %v1151_v19, %v1088_v21  ;;  %v1144_v45 = vld [vmem:[#allocation2 + $0x134] sm:$0xf0] }
 0x182   :  { %v301_v40 = vpop.f32.mrf.mxu2 }
 0x183   :  { %v376_v35 = vmax.f32 %v368_v31, 0.0  ;;  %v384_v51 = vpack.c.bf16 %v379_v47, %v378_v46  ;;  %v352_v54 = vmul.f32 %v1353_v52, %v301_v40  ;;  %741 = vmatpush.bf16.msrb.mxu3 %v1091_v25  ;;  %v1070_v31 = vld [vmem:[#allocation2 + $0x150] sm:$0xf]  ;;  %v1145_v40 = vld [vmem:[#allocation2 + $0x144] sm:$0xf]  ;;  %v1055_v47 = vor.u32 %v1144_v45, %v1054_v44 }
 0x184   :  { %v293_v27 = vpop.f32.mrf.mxu0  ;;  %713 = vmatpush.bf16.msrb.mxu1 %v1079_v29  ;;  %v1143_v46 = vld [vmem:[#allocation2 + $0x134] sm:$0xf] }
 0x185   :  { %v349_v28 = vmul.f32 %v1343_v26, %v293_v27  ;;  %v360_v56 = vadd.f32 %v352_v54, %v235_v43  ;;  %v1149_v27 = vld [vmem:[#allocation2 + $0x164] sm:$0xf]  ;;  %v1067_v43 = vor.u32 %v1145_v40, %v1064_v42 }
 0x186   :  { %v1141_v54 = vld [vmem:[#allocation2 + $0x124] sm:$0xf] }
 0x187   :  { %v357_v30 = vadd.f32 %v349_v28, %v227_v8  ;;  %v372_v58 = vadd.f32 %v1165_v4, %v360_v56  ;;  %v1080_v28 = vld [vmem:[#allocation2 + $0x168] sm:$0xf0] }
 0x188   :  { %v1048_v56 = vld [vmem:[#allocation2 + $0x128] sm:$0xf0] }
 0x189   :  { %v369_v32 = vadd.f32 %v1165_v4, %v357_v30  ;;  %v380_v60 = vmax.f32 %v372_v58, 0.0  ;;  %v1083_v30 = vor.u32 %v1149_v27, %v1080_v28  ;;  %v1038_v58 = vld [vmem:[#allocation2 + $0x110] sm:$0xf] }
 0x18a   :  { %v303_v48 = vpop.f32.mrf.mxu2 }
 0x18b   :  { %v377_v36 = vmax.f32 %v369_v32, 0.0  ;;  %v353_v50 = vmul.f32 %v1350_v49, %v303_v48  ;;  %v1148_v32 = vld [vmem:[#allocation2 + $0x154] sm:$0xf0]  ;;  %742 = vmatpush.bf16.msrb.mxu3 %v1083_v30  ;;  %v1056_v48 = vld [vmem:[#allocation2 + $0x138] sm:$0xf0] }
 0x18d   :  { %v383_v39 = vpack.c.bf16 %v377_v36, %v376_v35  ;;  %v361_v55 = vadd.f32 %v353_v50, %v237_v53  ;;  %v1072_v35 = vld [vmem:[#allocation2 + $0x158] sm:$0xf0]  ;;  %v1071_v36 = vor.u32 %v1148_v32, %v1070_v31  ;;  %v1059_v50 = vor.u32 %v1143_v46, %v1056_v48  ;;  %v1142_v53 = vld [vmem:[#allocation2 + $0x124] sm:$0xf0] }
 0x18e   :  { %v1075_v37 = vor.u32 %v1147_v33, %v1072_v35 }
 0x18f   :  { %496 = vmatmul.bf16.gmra.mxu3 %v383_v39  ;;  %525 = vmatmul.bf16.gmra.mxu2 %v383_v39  ;;  %v373_v57 = vadd.f32 %v1165_v4, %v361_v55  ;;  %v1146_v39 = vld [vmem:[#allocation2 + $0x144] sm:$0xf0] }
 0x190   :  { %714 = vmatpush.bf16.msrb.mxu1 %v1071_v36  ;;  %743 = vmatpush.bf16.msrb.mxu3 %v1075_v37  ;;  %v1063_v41 = vor.u32 %v1146_v39, %v1062_v38 }
 0x191   :  { %v381_v59 = vmax.f32 %v373_v57, 0.0  ;;  %v1051_v57 = vor.u32 %v1141_v54, %v1048_v56 }
 0x193   :  { %v385_v61 = vpack.c.bf16 %v381_v59, %v380_v60  ;;  %v1140_v59 = vld [vmem:[#allocation2 + $0x114] sm:$0xf0]  ;;  %v1139_v60 = vld [vmem:[#allocation2 + $0x114] sm:$0xf] }
 0x194   :  { %715 = vmatpush.bf16.msrb.mxu1 %v1063_v41  ;;  %744 = vmatpush.bf16.msrb.mxu3 %v1067_v43 }
 0x198   :  { %716 = vmatpush.bf16.msrb.mxu1 %v1055_v47  ;;  %745 = vmatpush.bf16.msrb.mxu3 %v1059_v50 }
 0x19c   :  { %746 = vmatpush.bf16.msrb.mxu3 %v1051_v57 }
 0x19f   :  { %501 = vmatmul.bf16.gmra.mxu3 %v384_v51  ;;  %530 = vmatmul.bf16.gmra.mxu2 %v384_v51  ;;  %v1046_v51 = vld [vmem:[#allocation2 + $0x120] sm:$0xf] }
 0x1a0   :  { %v1047_v55 = vor.u32 %v1142_v53, %v1046_v51 }
 0x1a2   :  { %717 = vmatpush.bf16.msrb.mxu1 %v1047_v55 }
 0x1af   :  { %506 = vmatmul.bf16.gmra.mxu3 %v385_v61  ;;  %535 = vmatmul.bf16.gmra.mxu2 %v385_v61  ;;  %v1039_v61 = vor.u32 %v1140_v59, %v1038_v58 }
 0x1b1   :  { %718 = vmatpush.bf16.msrb.mxu1 %v1039_v61 }
 0x202   :  { %v492_v62 = vpop.f32.mrf.mxu3 }
 0x20a   :  { %v494_v0 = vpop.f32.mrf.mxu3 }
 0x20b   :  { %v541_v4 = vpack.c.bf16 %v494_v0, %v492_v62  ;;  %v1040_v62 = vld [vmem:[#allocation2 + $0x118] sm:$0xf0] }
 0x20c   :  { %v1043_v0 = vor.u32 %v1139_v60, %v1040_v62 }
 0x20e   :  { %747 = vmatpush.bf16.msrb.mxu3 %v1043_v0 }
 0x212   :  { %v497_v1 = vpop.f32.mrf.mxu3 }
 0x21a   :  { %v499_v2 = vpop.f32.mrf.mxu3 }
 0x21b   :  { %v542_v15 = vpack.c.bf16 %v499_v2, %v497_v1  ;;  %v1030_v1 = vld [vmem:[#allocation2 + $0x100] sm:$0xf]  ;;  %v1138_v2 = vld [vmem:[#allocation2 + $0x104] sm:$0xf0] }
 0x222   :  { %v502_v3 = vpop.f32.mrf.mxu3 }
 0x22a   :  { %v504_v6 = vpop.f32.mrf.mxu3 }
 0x22b   :  { %v543_v14 = vpack.c.bf16 %v504_v6, %v502_v3  ;;  %v1137_v3 = vld [vmem:[#allocation2 + $0x104] sm:$0xf]  ;;  %v1031_v6 = vor.u32 %v1138_v2, %v1030_v1 }
 0x22d   :  { %719 = vmatpush.bf16.msrb.mxu1 %v1031_v6 }
 0x232   :  { %v507_v7 = vpop.f32.mrf.mxu3 }
 0x23a   :  { %v509_v8 = vpop.f32.mrf.mxu3 }
 0x23b   :  { %v544_v13 = vpack.c.bf16 %v509_v8, %v507_v7  ;;  %v1032_v7 = vld [vmem:[#allocation2 + $0x108] sm:$0xf0] }
 0x23c   :  { %v1035_v8 = vor.u32 %v1137_v3, %v1032_v7 }
 0x23d   :  { %549 = vmatpush.bf16.msra.mxu0 %v544_v13  ;;  %v521_v13 = vpop.f32.mrf.mxu2 }
 0x23e   :  { %748 = vmatpush.bf16.msrb.mxu3 %v1035_v8 }
 0x241   :  { %550 = vmatpush.bf16.msra.mxu0 %v543_v14 }
 0x245   :  { %551 = vmatpush.bf16.msra.mxu0 %v542_v15  ;;  %v523_v14 = vpop.f32.mrf.mxu2 }
 0x249   :  { %552 = vmatpush.bf16.msra.mxu0 %v541_v4 }
 0x24c   :  { %1023 = vmatmul.msk.bf16.vlgmr.msra.gmra.mxu0 %vm264_vm0, %v1304_v9 }
 0x24d   :  { %v526_v19 = vpop.f32.mrf.mxu2 }
 0x255   :  { %v528_v31 = vpop.f32.mrf.mxu2 }
 0x25c   :  { %1024 = vmatmul.msk.bf16.gmra.mxu0 %vm264_vm0, %v1318_v11 }
 0x25d   :  { %v531_v39 = vpop.f32.mrf.mxu2 }
 0x265   :  { %v533_v46 = vpop.f32.mrf.mxu2 }
 0x26c   :  { %1025 = vmatmul.msk.bf16.gmra.mxu0 %vm264_vm0, %v1309_v10 }
 0x26d   :  { %v536_v57 = vpop.f32.mrf.mxu2 }
 0x275   :  { %v538_v1 = vpop.f32.mrf.mxu2 }
 0x27c   :  { %1026 = vmatmul.msk.bf16.gmra.mxu0 %vm264_vm0, %v1323_v12 }
 0x2c9   :  { %v554_v15 = vpop.f32.mrf.mxu0 }
 0x2ca   :  { %v574_v4 = vmul.f32 %v554_v15, %v1329_v63 }
 0x2cc   :  { %v582_v17 = vadd.f32 %v574_v4, %v521_v13 }
 0x2ce   :  { %v595_v22 = vadd.f32 %v1166_v18, %v582_v17 }
 0x2d0   :  { %v603_v27 = vmax.f32 %v595_v22, 0.0 }
 0x2d1   :  { %v556_v20 = vpop.f32.mrf.mxu0 }
 0x2d2   :  { %v575_v21 = vmul.f32 %v556_v20, %v1335_v5 }
 0x2d4   :  { %v583_v23 = vadd.f32 %v575_v21, %v523_v14 }
 0x2d6   :  { %v596_v25 = vadd.f32 %v1166_v18, %v583_v23 }
 0x2d8   :  { %v604_v28 = vmax.f32 %v596_v25, 0.0 }
 0x2d9   :  { %v559_v29 = vpop.f32.mrf.mxu0 }
 0x2da   :  { %v611_v30 = vpack.c.bf16 %v604_v28, %v603_v27  ;;  %v576_v32 = vmul.f32 %v559_v29, %v1338_v16 }
 0x2dc   :  { %720 = vmatmul.bf16.vlgmr.msrb.gmra.mxu1 %v611_v30  ;;  %749 = vmatmul.bf16.vlgmr.msrb.gmra.mxu3 %v611_v30  ;;  %v584_v33 = vadd.f32 %v576_v32, %v526_v19  ;;  %v1167_v32 = vld [vmem:[%s1404_s4 + $0x2] ss:$0 sm:$0xff]  ;;  %s1224_s4 = smov [#allocation5]  }
 0x2dd   :  { %s844_s9 = sshll.u32 %s1224_s4, 4  ;;  %s845_s9 = int_to_ptr.vmem [resolvable:$true] %s844_s9 }
 0x2de   :  { %v597_v38 = vadd.f32 %v1166_v18, %v584_v33 }
 0x2e0   :  { %v605_v41 = vmax.f32 %v597_v38, 0.0 }
 0x2e1   :  { %v561_v35 = vpop.f32.mrf.mxu0 }
 0x2e2   :  { %v577_v36 = vmul.f32 %v561_v35, %v1343_v26 }
 0x2e4   :  { %v585_v37 = vadd.f32 %v577_v36, %v528_v31 }
 0x2e6   :  { %v598_v40 = vadd.f32 %v1166_v18, %v585_v37 }
 0x2e8   :  { %v606_v42 = vmax.f32 %v598_v40, 0.0 }
 0x2e9   :  { %v564_v43 = vpop.f32.mrf.mxu0 }
 0x2ea   :  { %v612_v44 = vpack.c.bf16 %v606_v42, %v605_v41  ;;  %v578_v45 = vmul.f32 %v564_v43, %v1341_v24 }
 0x2ec   :  { %725 = vmatmul.bf16.gmra.mxu1 %v612_v44  ;;  %754 = vmatmul.bf16.gmra.mxu3 %v612_v44  ;;  %v586_v47 = vadd.f32 %v578_v45, %v531_v39 }
 0x2ee   :  { %v599_v53 = vadd.f32 %v1166_v18, %v586_v47 }
 0x2f0   :  { %v607_v55 = vmax.f32 %v599_v53, 0.0 }
 0x2f1   :  { %v566_v48 = vpop.f32.mrf.mxu0 }
 0x2f2   :  { %v579_v50 = vmul.f32 %v566_v48, %v1346_v34 }
 0x2f4   :  { %v587_v51 = vadd.f32 %v579_v50, %v533_v46 }
 0x2f6   :  { %v600_v54 = vadd.f32 %v1166_v18, %v587_v51 }
 0x2f8   :  { %v608_v56 = vmax.f32 %v600_v54, 0.0 }
 0x2f9   :  { %v569_v58 = vpop.f32.mrf.mxu0 }
 0x2fa   :  { %v613_v59 = vpack.c.bf16 %v608_v56, %v607_v55  ;;  %v580_v60 = vmul.f32 %v569_v58, %v1353_v52 }
 0x2fc   :  { %730 = vmatmul.bf16.gmra.mxu1 %v613_v59  ;;  %759 = vmatmul.bf16.gmra.mxu3 %v613_v59  ;;  %v588_v61 = vadd.f32 %v580_v60, %v536_v57 }
 0x2fe   :  { %v601_v3 = vadd.f32 %v1166_v18, %v588_v61 }
 0x300   :  { %v609_v7 = vmax.f32 %v601_v3, 0.0 }
 0x301   :  { %v571_v62 = vpop.f32.mrf.mxu0 }
 0x302   :  { %v581_v0 = vmul.f32 %v571_v62, %v1350_v49 }
 0x304   :  { %v589_v2 = vadd.f32 %v581_v0, %v538_v1 }
 0x306   :  { %v602_v6 = vadd.f32 %v1166_v18, %v589_v2 }
 0x308   :  { %v610_v8 = vmax.f32 %v602_v6, 0.0 }
 0x30a   :  { %v614_v13 = vpack.c.bf16 %v610_v8, %v609_v7 }
 0x30c   :  { %735 = vmatmul.bf16.gmra.mxu1 %v614_v13  ;;  %764 = vmatmul.bf16.gmra.mxu3 %v614_v13 }
 0x359   :  { %v721_v14 = vpop.f32.mrf.mxu1 }
 0x35f   :  { %v750_v28 = vpop.f32.mrf.mxu3 }
 0x361   :  { %v723_v15 = vpop.f32.mrf.mxu1 }
 0x362   :  { %v770_v18 = vpack.c.bf16 %v723_v15, %v721_v14 }
 0x367   :  { %v752_v29 = vpop.f32.mrf.mxu3 }
 0x369   :  { %v726_v4 = vpop.f32.mrf.mxu1 }
 0x36f   :  { %v755_v35 = vpop.f32.mrf.mxu3 }
 0x371   :  { %v728_v17 = vpop.f32.mrf.mxu1 }
 0x372   :  { %v771_v27 = vpack.c.bf16 %v728_v17, %v726_v4 }
 0x377   :  { %v757_v39 = vpop.f32.mrf.mxu3 }
 0x379   :  { %v731_v19 = vpop.f32.mrf.mxu1 }
 0x37f   :  { %v760_v44 = vpop.f32.mrf.mxu3 }
 0x381   :  { %v733_v20 = vpop.f32.mrf.mxu1 }
 0x382   :  { %v772_v25 = vpack.c.bf16 %v733_v20, %v731_v19 }
 0x387   :  { %v762_v50 = vpop.f32.mrf.mxu3 }
 0x389   :  { %v736_v21 = vpop.f32.mrf.mxu1 }
 0x38f   :  { %v765_v55 = vpop.f32.mrf.mxu3 }
 0x391   :  { %v738_v22 = vpop.f32.mrf.mxu1 }
 0x392   :  { %v773_v23 = vpack.c.bf16 %v738_v22, %v736_v21 }
 0x394   :  { %778 = vmatpush.bf16.msra.mxu2 %v773_v23 }
 0x397   :  { %v767_v60 = vpop.f32.mrf.mxu3 }
 0x398   :  { %779 = vmatpush.bf16.msra.mxu2 %v772_v25 }
 0x39c   :  { %780 = vmatpush.bf16.msra.mxu2 %v771_v27 }
 0x3a0   :  { %781 = vmatpush.bf16.msra.mxu2 %v770_v18 }
 0x3a3   :  { %1092 = vmatmul.msk.bf16.vlgmr.msra.gmra.mxu2 %vm264_vm0, %v1304_v9 }
 0x3b3   :  { %1093 = vmatmul.msk.bf16.gmra.mxu2 %vm264_vm0, %v1318_v11 }
 0x3c3   :  { %1094 = vmatmul.msk.bf16.gmra.mxu2 %vm264_vm0, %v1309_v10 }
 0x3d3   :  { %1095 = vmatmul.msk.bf16.gmra.mxu2 %vm264_vm0, %v1323_v12 }
 0x426   :  { %v783_v30 = vpop.f32.mrf.mxu2 }
 0x427   :  { %v803_v31 = vmul.f32 %v783_v30, %v1329_v63 }
 0x429   :  { %v811_v33 = vadd.f32 %v803_v31, %v750_v28 }
 0x42b   :  { %v824_v9 = vadd.f32 %v1167_v32, %v811_v33 }
 0x42d   :  { %832 = vst [vmem:[#allocation5] sm:$0xff] %v824_v9 }
 0x42e   :  { %v785_v11 = vpop.f32.mrf.mxu2 }
 0x42f   :  { %v804_v36 = vmul.f32 %v785_v11, %v1335_v5 }
 0x431   :  { %v812_v10 = vadd.f32 %v804_v36, %v752_v29 }
 0x433   :  { %v825_v37 = vadd.f32 %v1167_v32, %v812_v10 }
 0x435   :  { %833 = vst [vmem:[#allocation5 + $0x8] sm:$0xff] %v825_v37 }
 0x436   :  { %v788_v12 = vpop.f32.mrf.mxu2 }
 0x437   :  { %v805_v38 = vmul.f32 %v788_v12, %v1338_v16 }
 0x439   :  { %v813_v40 = vadd.f32 %v805_v38, %v755_v35 }
 0x43b   :  { %v826_v63 = vadd.f32 %v1167_v32, %v813_v40 }
 0x43d   :  { %834 = vst [vmem:[#allocation5 + $0x10] sm:$0xff] %v826_v63 }
 0x43e   :  { %v790_v41 = vpop.f32.mrf.mxu2 }
 0x43f   :  { %v806_v42 = vmul.f32 %v790_v41, %v1343_v26 }
 0x441   :  { %v814_v43 = vadd.f32 %v806_v42, %v757_v39 }
 0x443   :  { %v827_v45 = vadd.f32 %v1167_v32, %v814_v43 }
 0x445   :  { %835 = vst [vmem:[#allocation5 + $0x18] sm:$0xff] %v827_v45 }
 0x446   :  { %v793_v46 = vpop.f32.mrf.mxu2 }
 0x447   :  { %v807_v5 = vmul.f32 %v793_v46, %v1341_v24 }
 0x449   :  { %v815_v47 = vadd.f32 %v807_v5, %v760_v44 }
 0x44b   :  { %v828_v48 = vadd.f32 %v1167_v32, %v815_v47 }
 0x44d   :  { %836 = vst [vmem:[#allocation5 + $0x20] sm:$0xff] %v828_v48 }
 0x44e   :  { %v795_v51 = vpop.f32.mrf.mxu2 }
 0x44f   :  { %v808_v16 = vmul.f32 %v795_v51, %v1346_v34 }
 0x451   :  { %v816_v53 = vadd.f32 %v808_v16, %v762_v50 }
 0x453   :  { %v829_v54 = vadd.f32 %v1167_v32, %v816_v53 }
 0x455   :  { %837 = vst [vmem:[#allocation5 + $0x28] sm:$0xff] %v829_v54 }
 0x456   :  { %v798_v56 = vpop.f32.mrf.mxu2 }
 0x457   :  { %v809_v26 = vmul.f32 %v798_v56, %v1353_v52 }
 0x459   :  { %v817_v57 = vadd.f32 %v809_v26, %v765_v55 }
 0x45b   :  { %v830_v58 = vadd.f32 %v1167_v32, %v817_v57 }
 0x45d   :  { %838 = vst [vmem:[#allocation5 + $0x30] sm:$0xff] %v830_v58 }
 0x45e   :  { %v800_v59 = vpop.f32.mrf.mxu2 }
 0x45f   :  { %v810_v24 = vmul.f32 %v800_v59, %v1350_v49 }
 0x461   :  { %v818_v34 = vadd.f32 %v810_v24, %v767_v60 }
 0x463   :  { %v831_v61 = vadd.f32 %v1167_v32, %v818_v34 }
 0x465   :  { %839 = vst [vmem:[#allocation5 + $0x38] sm:$0xff] %v831_v61 }
 0x466   :  { %852 = dma.vmem_to_hbm [thread:$0]  %s845_s9, 1024, %s847_s12, [#allocation4], %s1221_s23, %s1221_s23, %s1222_s24  }
 0x467   :  { %1218 = dma.done.wait [#allocation4], 1024  }
 0x468   :  { %1219 = vsyncadd [#allocation4], 4294966272 }
 0x469   :  { %857 = vsyncpa [#allocation3], 1 }
 0x46a   :  { %858 = vsyncpa [#allocation4], 1 }

</bundles_post_ra>
